<compile_context>
chip_gen: v7x
topology: tpu7x:2x2x1
jax: 0.10.0
libtpu: 0.0.40
codegen_flags: <defaults>
</compile_context>

<pallas_src>
import numpy as np
import jax
import jax.numpy as jnp
from jax.experimental import pallas as pl
from jax.experimental.pallas import tpu as pltpu


# ----------------------------------------------------------------------------
# Pallas kernel: whole BasicBlock, single invocation (no grid)
# ----------------------------------------------------------------------------
def _make_kernel(N, H, W):
    L = N * H * W
    # Tap t = 3*dy + dx reads the input at flat offset o = (dy-1)*W + (dx-1).
    # pltpu.roll(x, s, axis=1)[:, p] == x[:, (p - s) % L]  =>  s = (-o) % L.
    # In-bounds taps never cross image boundaries; out-of-bounds (wrapping)
    # taps are zeroed by the mask.
    shifts = tuple((-((dy - 1) * W + (dx - 1))) % L
                   for dy in range(3) for dx in range(3))

    def kernel(x_ref, mask_ref, w1_ref, b1_ref, w2_ref, b2_ref, out_ref):
        x = x_ref[...]                               # (C, L)    f32
        mask = mask_ref[...]                         # (9*C, L)  f32 in {0,1}

        def conv3x3_bn(inp, w_ref, b_ref):
            # 3x3 'same' conv + folded BN scale as ONE K=9*C MXU matmul.
            taps = [inp if s == 0 else pltpu.roll(inp, s, axis=1)
                    for s in shifts]                            # 9 x (C, L) f32
            stack = (jnp.concatenate(taps, axis=0) * mask)      # (9*C, L) f32
            stack = stack.astype(jnp.bfloat16)
            acc = jnp.dot(w_ref[...], stack,
                          preferred_element_type=jnp.float32)   # (C, L) f32
            return acc + b_ref[...]                             # per-channel bias

        y1 = jnp.maximum(conv3x3_bn(x, w1_ref, b1_ref), 0.0)    # ConvBnReLU
        y2 = conv3x3_bn(y1, w2_ref, b2_ref)                     # ConvBn
        out_ref[...] = jnp.maximum(y2 + x, 0.0)                 # residual + ReLU

    return kernel


# ----------------------------------------------------------------------------
# Host-side helpers (mask table, BN folding, weight slab)
# ----------------------------------------------------------------------------
def _tap_masks(H, W):
    """(9, H*W) {0,1}: tap t=3*dy+dx valid where (y+dy-1, x+dx-1) in-bounds."""
    y, x = np.meshgrid(np.arange(H), np.arange(W), indexing="ij")
    rows = []
    for dy in range(3):
        for dx in range(3):
            m = ((y + dy - 1 >= 0) & (y + dy - 1 < H) &
                 (x + dx - 1 >= 0) & (x + dx - 1 < W))
            rows.append(m.reshape(-1))
    return np.stack(rows).astype(np.float32)


def _fold_bn_into_weight(w_oihw, gamma, beta, mean, var, eps=1e-3):
    """Fold BN scale into a lane-dense (C_out, 9*C_in) bf16 weight slab.

    Column ordering t*C_in + c_in with t = 3*dy + dx matches the kernel's
    stacked-tap layout. Fold is done in f32, then cast to bf16.
    Returns (w_bf16 (C_out, 9*C_in), bias_f32 (C_out, 1)).
    """
    C_out, C_in, _, _ = w_oihw.shape
    scale = gamma / jnp.sqrt(var + eps)                      # f32 (C_out,)
    bias = (beta - mean * scale).reshape(C_out, 1).astype(jnp.float32)
    w2d = jnp.transpose(w_oihw, (0, 2, 3, 1)).reshape(C_out, 9 * C_in)
    w_folded = (w2d * scale[:, None]).astype(jnp.bfloat16)
    return w_folded, bias


# ----------------------------------------------------------------------------
# Wrapper: BasicBlock.forward, NCHW in / NCHW out
# ----------------------------------------------------------------------------
def basic_block_forward(x_nchw, params):
    N, C, H, W = x_nchw.shape
    Cf = params["w_conv1"].shape[0]
    assert Cf == C, "downsample=False identity residual needs num_filters == num_channels"
    HW = H * W
    L = N * HW

    # NCHW -> (C, N*H*W): channels on sublanes, batch*spatial on lanes.
    x_f = jnp.transpose(x_nchw.reshape(N, C, HW), (1, 0, 2)).reshape(C, L)
    x_f = x_f.astype(jnp.float32)

    # Boundary masks, tiled per image and expanded to the stacked layout.
    mask9 = _tap_masks(H, W)                                  # (9, HW)
    mask = np.repeat(np.tile(mask9, (1, N)), C, axis=0)       # (9*C, N*HW)
    mask = jnp.asarray(mask, jnp.float32)

    # BN-scale-folded weight slabs (bf16) + f32 biases.
    w1, b1 = _fold_bn_into_weight(params["w_conv1"], params["bn1_gamma"],
                                  params["bn1_beta"], params["bn1_mean"],
                                  params["bn1_var"])
    w2, b2 = _fold_bn_into_weight(params["w_conv2"], params["bn2_gamma"],
                                  params["bn2_beta"], params["bn2_mean"],
                                  params["bn2_var"])

    vmem = pl.BlockSpec(memory_space=pltpu.MemorySpace.VMEM)

    out_f = pl.pallas_call(
        _make_kernel(N, H, W),
        out_shape=jax.ShapeDtypeStruct((C, L), jnp.float32),
        in_specs=[vmem] * 6,
        out_specs=vmem,
    )(x_f, mask, w1, b1, w2, b2)

    # (C, N*HW) -> NCHW
    return jnp.transpose(out_f.reshape(C, N, HW), (1, 0, 2)).reshape(N, C, H, W)


# ----------------------------------------------------------------------------
# Pure NumPy float64 reference (correctness check)
# ----------------------------------------------------------------------------
def _reference_forward(x, params, eps=1e-3):
    def conv3x3_same(inp, wt):
        n, c, h, ww = inp.shape
        xp = np.zeros((n, c, h + 2, ww + 2), np.float64)
        xp[:, :, 1:h + 1, 1:ww + 1] = inp
        out = np.zeros((n, wt.shape[0], h, ww), np.float64)
        for dy in range(3):
            for dx in range(3):
                out += np.einsum("oc,nchw->nohw", wt[:, :, dy, dx],
                                 xp[:, :, dy:dy + h, dx:dx + ww])
        return out

    def bn(v, g, b, m, var):
        s = g / np.sqrt(var + eps)
        return v * s[None, :, None, None] + (b - m * s)[None, :, None, None]

    x64 = np.asarray(x, np.float64)
    p = {k: np.asarray(v, np.float64) for k, v in params.items()}
    y1 = np.maximum(bn(conv3x3_same(x64, p["w_conv1"]),
                       p["bn1_gamma"], p["bn1_beta"], p["bn1_mean"], p["bn1_var"]), 0.0)
    y2 = bn(conv3x3_same(y1, p["w_conv2"]),
            p["bn2_gamma"], p["bn2_beta"], p["bn2_mean"], p["bn2_var"])
    return np.maximum(y2 + x64, 0.0)


# ----------------------------------------------------------------------------
# Deterministic parameters + example run
# ----------------------------------------------------------------------------
def _make_params(key, c):
    ks = jax.random.split(key, 10)
    return {
        # ConvBnReLU(in=c, out=c, k=3, stride=1, padding='same')
        "w_conv1": 0.1 * jax.random.normal(ks[0], (c, c, 3, 3), jnp.float32),
        "bn1_gamma": 1.0 + 0.1 * jax.random.normal(ks[1], (c,), jnp.float32),
        "bn1_beta": 0.05 * jax.random.normal(ks[2], (c,), jnp.float32),
        "bn1_mean": 0.05 * jax.random.normal(ks[3], (c,), jnp.float32),
        "bn1_var": 1.0 + 0.1 * jnp.abs(jax.random.normal(ks[4], (c,), jnp.float32)),
        # ConvBn(in=c, out=c, k=3, padding='same')
        "w_conv2": 0.1 * jax.random.normal(ks[5], (c, c, 3, 3), jnp.float32),
        "bn2_gamma": 1.0 + 0.1 * jax.random.normal(ks[6], (c,), jnp.float32),
        "bn2_beta": 0.05 * jax.random.normal(ks[7], (c,), jnp.float32),
        "bn2_mean": 0.05 * jax.random.normal(ks[8], (c,), jnp.float32),
        "bn2_var": 1.0 + 0.1 * jnp.abs(jax.random.normal(ks[9], (c,), jnp.float32)),
    }


if __name__ == "__main__":
    key = jax.random.PRNGKey(0)
    k_x, k_p = jax.random.split(key)

    N, C, H, W = 2, 8, 16, 16          # num_channels == num_filters == 8
    x = jax.random.normal(k_x, (N, C, H, W), jnp.float32)    # NCHW
    params = _make_params(k_p, C)

    out = jax.block_until_ready(basic_block_forward(x, params))

    assert out.shape == (N, C, H, W)
    assert bool(jnp.all(jnp.isfinite(out)))
    assert bool(jnp.all(out >= 0.0))

    ref = _reference_forward(np.asarray(x), params)
    np.testing.assert_allclose(np.asarray(out), ref, rtol=5e-2, atol=5e-2)

    print("KERNEL_OK")
</pallas_src>

<mosaic_0001>
module attributes {stable_mosaic.version = 11 : i64} {
  func.func @kernel(%arg0: memref<8x512xf32, #tpu.memory_space<vmem>>, %arg1: memref<72x512xf32, #tpu.memory_space<vmem>>, %arg2: memref<8x72xbf16, #tpu.memory_space<vmem>>, %arg3: memref<8x1xf32, #tpu.memory_space<vmem>>, %arg4: memref<8x72xbf16, #tpu.memory_space<vmem>>, %arg5: memref<8x1xf32, #tpu.memory_space<vmem>>, %arg6: memref<8x512xf32, #tpu.memory_space<vmem>>) attributes {dimension_semantics = [], scalar_prefetch = 0 : i64, scratch_operands = 0 : i64, tpu.core_type = #tpu.core_type<tc>} {
    %c0 = arith.constant 0 : index
    %c0_0 = arith.constant 0 : index
    %0 = vector.load %arg0[%c0, %c0_0] : memref<8x512xf32, #tpu.memory_space<vmem>>, vector<8x512xf32>
    %c0_1 = arith.constant 0 : index
    %c0_2 = arith.constant 0 : index
    %1 = vector.load %arg1[%c0_1, %c0_2] : memref<72x512xf32, #tpu.memory_space<vmem>>, vector<72x512xf32>
    %c17_i32 = arith.constant 17 : i32
    %2 = tpu.dynamic_rotate %0 by %c17_i32 dim 1 : vector<8x512xf32>, i32 -> vector<8x512xf32>
    %c16_i32 = arith.constant 16 : i32
    %3 = tpu.dynamic_rotate %0 by %c16_i32 dim 1 : vector<8x512xf32>, i32 -> vector<8x512xf32>
    %c15_i32 = arith.constant 15 : i32
    %4 = tpu.dynamic_rotate %0 by %c15_i32 dim 1 : vector<8x512xf32>, i32 -> vector<8x512xf32>
    %c1_i32 = arith.constant 1 : i32
    %5 = tpu.dynamic_rotate %0 by %c1_i32 dim 1 : vector<8x512xf32>, i32 -> vector<8x512xf32>
    %c511_i32 = arith.constant 511 : i32
    %6 = tpu.dynamic_rotate %0 by %c511_i32 dim 1 : vector<8x512xf32>, i32 -> vector<8x512xf32>
    %c497_i32 = arith.constant 497 : i32
    %7 = tpu.dynamic_rotate %0 by %c497_i32 dim 1 : vector<8x512xf32>, i32 -> vector<8x512xf32>
    %c496_i32 = arith.constant 496 : i32
    %8 = tpu.dynamic_rotate %0 by %c496_i32 dim 1 : vector<8x512xf32>, i32 -> vector<8x512xf32>
    %c495_i32 = arith.constant 495 : i32
    %9 = tpu.dynamic_rotate %0 by %c495_i32 dim 1 : vector<8x512xf32>, i32 -> vector<8x512xf32>
    %10 = tpu.concatenate %2, %3, %4, %5, %0, %6, %7, %8, %9 in 0 : vector<8x512xf32>, vector<8x512xf32>, vector<8x512xf32>, vector<8x512xf32>, vector<8x512xf32>, vector<8x512xf32>, vector<8x512xf32>, vector<8x512xf32>, vector<8x512xf32> -> vector<72x512xf32>
    %11 = arith.mulf %10, %1 : vector<72x512xf32>
    %12 = arith.truncf %11 : vector<72x512xf32> to vector<72x512xbf16>
    %c0_3 = arith.constant 0 : index
    %c0_4 = arith.constant 0 : index
    %13 = vector.load %arg2[%c0_3, %c0_4] : memref<8x72xbf16, #tpu.memory_space<vmem>>, vector<8x72xbf16>
    %cst = arith.constant dense<0.000000e+00> : vector<8x512xf32>
    %14 = tpu.matmul %13, %12, %cst {dimension_numbers = #tpu.dot_dimension_numbers<[1], [0], [0], [1], [0, 0, 1, 1], [], []>} : vector<8x72xbf16>, vector<72x512xbf16>, vector<8x512xf32> -> vector<8x512xf32>
    %c0_5 = arith.constant 0 : index
    %c0_6 = arith.constant 0 : index
    %15 = vector.load %arg3[%c0_5, %c0_6] : memref<8x1xf32, #tpu.memory_space<vmem>>, vector<8x1xf32>
    %16 = vector.broadcast %15 : vector<8x1xf32> to vector<8x512xf32>
    %17 = arith.addf %14, %16 : vector<8x512xf32>
    %cst_7 = arith.constant 0.000000e+00 : f32
    %18 = vector.broadcast %cst_7 : f32 to vector<8x512xf32>
    %19 = arith.maximumf %17, %18 : vector<8x512xf32>
    %c17_i32_8 = arith.constant 17 : i32
    %20 = tpu.dynamic_rotate %19 by %c17_i32_8 dim 1 : vector<8x512xf32>, i32 -> vector<8x512xf32>
    %c16_i32_9 = arith.constant 16 : i32
    %21 = tpu.dynamic_rotate %19 by %c16_i32_9 dim 1 : vector<8x512xf32>, i32 -> vector<8x512xf32>
    %c15_i32_10 = arith.constant 15 : i32
    %22 = tpu.dynamic_rotate %19 by %c15_i32_10 dim 1 : vector<8x512xf32>, i32 -> vector<8x512xf32>
    %c1_i32_11 = arith.constant 1 : i32
    %23 = tpu.dynamic_rotate %19 by %c1_i32_11 dim 1 : vector<8x512xf32>, i32 -> vector<8x512xf32>
    %c511_i32_12 = arith.constant 511 : i32
    %24 = tpu.dynamic_rotate %19 by %c511_i32_12 dim 1 : vector<8x512xf32>, i32 -> vector<8x512xf32>
    %c497_i32_13 = arith.constant 497 : i32
    %25 = tpu.dynamic_rotate %19 by %c497_i32_13 dim 1 : vector<8x512xf32>, i32 -> vector<8x512xf32>
    %c496_i32_14 = arith.constant 496 : i32
    %26 = tpu.dynamic_rotate %19 by %c496_i32_14 dim 1 : vector<8x512xf32>, i32 -> vector<8x512xf32>
    %c495_i32_15 = arith.constant 495 : i32
    %27 = tpu.dynamic_rotate %19 by %c495_i32_15 dim 1 : vector<8x512xf32>, i32 -> vector<8x512xf32>
    %28 = tpu.concatenate %20, %21, %22, %23, %19, %24, %25, %26, %27 in 0 : vector<8x512xf32>, vector<8x512xf32>, vector<8x512xf32>, vector<8x512xf32>, vector<8x512xf32>, vector<8x512xf32>, vector<8x512xf32>, vector<8x512xf32>, vector<8x512xf32> -> vector<72x512xf32>
    %29 = arith.mulf %28, %1 : vector<72x512xf32>
    %30 = arith.truncf %29 : vector<72x512xf32> to vector<72x512xbf16>
    %c0_16 = arith.constant 0 : index
    %c0_17 = arith.constant 0 : index
    %31 = vector.load %arg4[%c0_16, %c0_17] : memref<8x72xbf16, #tpu.memory_space<vmem>>, vector<8x72xbf16>
    %cst_18 = arith.constant dense<0.000000e+00> : vector<8x512xf32>
    %32 = tpu.matmul %31, %30, %cst_18 {dimension_numbers = #tpu.dot_dimension_numbers<[1], [0], [0], [1], [0, 0, 1, 1], [], []>} : vector<8x72xbf16>, vector<72x512xbf16>, vector<8x512xf32> -> vector<8x512xf32>
    %c0_19 = arith.constant 0 : index
    %c0_20 = arith.constant 0 : index
    %33 = vector.load %arg5[%c0_19, %c0_20] : memref<8x1xf32, #tpu.memory_space<vmem>>, vector<8x1xf32>
    %34 = vector.broadcast %33 : vector<8x1xf32> to vector<8x512xf32>
    %35 = arith.addf %32, %34 : vector<8x512xf32>
    %36 = arith.addf %35, %0 : vector<8x512xf32>
    %cst_21 = arith.constant 0.000000e+00 : f32
    %37 = vector.broadcast %cst_21 : f32 to vector<8x512xf32>
    %38 = arith.maximumf %36, %37 : vector<8x512xf32>
    %c0_22 = arith.constant 0 : index
    %c0_23 = arith.constant 0 : index
    %39 = vector.load %arg6[%c0_22, %c0_23] : memref<8x512xf32, #tpu.memory_space<vmem>>, vector<8x512xf32>
    tpu.vector_store %arg6[%c0_22, %c0_23], %38 {strides = array<i32>} : memref<8x512xf32, #tpu.memory_space<vmem>>, vector<8x512xf32>,
    return
  }
}

</mosaic_0001>

<bundles_post_ra>
// kernel: tpu_custom_call.1
= control target key start
LH: loop header
LB: loop body
LE: loop exit
PB: predicated region body
PF: predicated region fallthrough
CT: control target
= control target key end

     0   :  { %11 = vsyncpa [#allocation3], 0  ;;  %s1301_s0 = inlined_call_operand.hbm [shape: f32[8,512], index: 0, kind: input, shape index: {}]   ;;  %s1302_s1 = inlined_call_operand.hbm [shape: f32[72,512], index: 1, kind: input, shape index: {}]   ;;  %s1303_s2 = inlined_call_operand.vmem [shape: bf16[8,72], index: 2, kind: input, shape index: {}]   ;;  %s1304_s3 = inlined_call_operand.vmem [shape: f32[8,1], index: 3, kind: input, shape index: {}]   ;;  %s1305_s4 = inlined_call_operand.vmem [shape: bf16[8,72], index: 4, kind: input, shape index: {}]   ;;  %s1306_s5 = inlined_call_operand.vmem [shape: f32[8,1], index: 5, kind: input, shape index: {}]   ;;  %s1307_s6 = inlined_call_operand.hbm [shape: f32[8,512], index: 6, kind: output, shape index: {}]  }
   0x1   :  { %12 = vsyncpa [#allocation6], 0 }
   0x2   :  { %13 = vsyncpa [#allocation4], 0  ;;  %s742_s21 = smov [#allocation2]   ;;  %s743_s23 = smov [#allocation5]  }
   0x3   :  { %s20_s22 = sshll.u32 %s742_s21, 4  ;;  %s29_s24 = sshll.u32 %s743_s23, 4  ;;  %s21_s22 = int_to_ptr.vmem [resolvable:$true] %s20_s22  ;;  %s791_s24 = int_to_ptr.vmem [resolvable:$true] %s29_s24 }
   0x4   :  { %s670_s27 = scalar_lea.hbm %s1301_s0, 512 }
   0x5   :  { %p671_p0 = scmp.ne.s32.totalorder %s1301_s0, %s670_s27  ;;  %p674_p1 = scmp.lt.u32.totalorder %s670_s27, %s1301_s0 }
   0x7   :  { %p676_p2 = pnand %p674_p1, %p671_p0 }
   0x9   :  { %679 = shalt.err (!%p676_p2)
}
   0xa   :  { %s680_s8 = scalar_lea.vmem %s21_s22, 512  ;;  %p685_p4 = scmp.lt.s32.totalorder %s21_s22, %s21_s22 }
   0xb   :  { %p681_p3 = scmp.ne.s32.totalorder %s21_s22, %s680_s8  ;;  %p686_p5 = scmp.lt.s32.totalorder %s680_s8, %s680_s8 }
   0xd   :  { %p687_p6 = por %p686_p5, %p685_p4 }
   0xf   :  { %p688_p7 = pnand %p687_p6, %p681_p3 }
  0x11   :  { %691 = shalt.err (!%p688_p7)
}
  0x12   :  { %23 = dma.hbm_to_vmem [thread:$0]  %s1301_s0, 512, %s21_s22, [#allocation3]  }
  0x13   :  { %s692_s13 = scalar_lea.hbm %s1302_s1, 4608 }
  0x14   :  { %p693_p8 = scmp.ne.s32.totalorder %s1302_s1, %s692_s13  ;;  %p696_p9 = scmp.lt.u32.totalorder %s692_s13, %s1302_s1 }
  0x16   :  { %p698_p10 = pnand %p696_p9, %p693_p8 }
  0x18   :  { %701 = shalt.err (!%p698_p10)
}
  0x19   :  { %s702_s18 = scalar_lea.vmem %s791_s24, 4608  ;;  %p707_p12 = scmp.lt.s32.totalorder %s791_s24, %s791_s24 }
  0x1a   :  { %p703_p11 = scmp.ne.s32.totalorder %s791_s24, %s702_s18  ;;  %p708_p13 = scmp.lt.s32.totalorder %s702_s18, %s702_s18 }
  0x1c   :  { %p709_p0 = por %p708_p13, %p707_p12 }
  0x1e   :  { %p710_p1 = pnand %p709_p0, %p703_p11 }
  0x20   :  { %713 = shalt.err (!%p710_p1)
}
  0x21   :  { %s744_s0 = smov 512   ;;  %s745_s19 = smov 32  }
  0x22   :  { %35 = dma.hbm_to_vmem [thread:$0]  %s1302_s1, 4608, %s791_s24, [#allocation6], %s744_s0, %s744_s0, %s745_s19  }
  0x23   :  { %736 = dma.done.wait [#allocation3], 512  }
  0x24   :  { %737 = vsyncadd [#allocation3], 4294966784 }
  0x25   :  { %738 = dma.done.wait [#allocation6], 4608  }
  0x26   :  { %739 = vsyncadd [#allocation6], 4294962688  ;;  %v822_v0 = vld [vmem:[#allocation2 + $0x10] sm:$0xff]  ;;  %v824_v1 = vld [vmem:[#allocation2] sm:$0xff]  ;;  %s746_s22 = smov 17   ;;  %s747_s1 = smov 16   ;;  %v99_v6 = vlaneseq }
  0x27   :  { %95 = vrot.lane.b32.xlu1 %v822_v0, %s746_s22  ;;  %91 = vrot.lane.b32.xlu0 %v824_v1, %s746_s22  ;;  %v830_v2 = vld [vmem:[#allocation2 + $0x18] sm:$0xff]  ;;  %v832_v3 = vld [vmem:[#allocation2 + $0x8] sm:$0xff]  ;;  %s748_s23 = smov 15   ;;  %s749_s24 = smov 1   ;;  %v753_v4 = vmov 0   ;;  %v254_v5 = vld [vmem:[%s1304_s3] sm:$0xff] }
  0x28   :  { %1309 = vst [vmem:[#allocation11_spill] sm:$0xff] %v830_v2  ;;  %s750_s25 = smov 127   ;;  %s751_s26 = smov 113   ;;  %309 = vmatprep.mubr.bf16.mxu0 %v753_v4  ;;  %350 = vmatprep.mubr.bf16.mxu1 %v753_v4  ;;  %v900_v9 = vand.u32 127, %v99_v6  ;;  %v906_v13 = vld [vmem:[#allocation5 + $0x8] sm:$0xff]  ;;  %v910_v17 = vld [vmem:[#allocation5] sm:$0xff] }
  0x29   :  { %s752_s27 = smov 112   ;;  %669 = vset.pattern.permute.xlu0 %v753_v4  ;;  %s754_s28 = smov 111   ;;  %v908_v14 = vld [vmem:[#allocation5 + $0x28] sm:$0xff]  ;;  %v916_v20 = vld [vmem:[#allocation5 + $0x10] sm:$0xff]  ;;  %v920_v22 = vld [vmem:[#allocation5 + $0x20] sm:$0xff]  ;;  %vm264_vm8 = vcmask 1043456  }
  0x2a   :  { %vm101_vm0 = vcmp.lt.s32.totalorder %v900_v9, 17  ;;  %vm114_vm1 = vcmp.lt.s32.totalorder %v900_v9, 16  ;;  %v926_v26 = vld [vmem:[#allocation5 + $0x30] sm:$0xff]  ;;  %v928_v27 = vld [vmem:[#allocation5 + $0x18] sm:$0xff]  ;;  %vm127_vm2 = vcmp.lt.s32.totalorder %v900_v9, 15  ;;  %vm140_vm3 = vcmp.lt.s32.totalorder %v900_v9, 1 }
  0x2b   :  { %97 = vrot.lane.b32.xlu1 %v830_v2, %s746_s22  ;;  %93 = vrot.lane.b32.xlu0 %v832_v3, %s746_s22  ;;  %v930_v28 = vld [vmem:[#allocation5 + $0x38] sm:$0xff]  ;;  %v946_v48 = vld [vmem:[#allocation5 + $0x48] sm:$0xff]  ;;  %v952_v53 = vld [vmem:[#allocation5 + $0x40] sm:$0xff]  ;;  %vm153_vm4 = vcmp.lt.s32.totalorder %v900_v9, 127  ;;  %vm179_vm5 = vcmp.lt.s32.totalorder %v900_v9, 112  ;;  %vm166_vm6 = vcmp.lt.s32.totalorder %v900_v9, 113 }
  0x2c   :  { %v950_v50 = vld [vmem:[#allocation5 + $0x68] sm:$0xff]  ;;  %v959_v57 = vld [vmem:[#allocation5 + $0x50] sm:$0xff]  ;;  %v961_v58 = vld [vmem:[#allocation5 + $0x58] sm:$0xff]  ;;  %vm192_vm7 = vcmp.lt.s32.totalorder %v900_v9, 111  ;;  %vm260_vm9 = vcmask 588800  }
  0x2d   :  { %v968_v62 = vld [vmem:[#allocation5 + $0x60] sm:$0xff]  ;;  %v970_v63 = vld [vmem:[#allocation5 + $0x70] sm:$0xff] }
  0x2f   :  { %108 = vrot.lane.b32.xlu1 %v832_v3, %s747_s1  ;;  %106 = vrot.lane.b32.xlu0 %v824_v1, %s747_s1 }
  0x33   :  { %112 = vrot.lane.b32.xlu1 %v830_v2, %s747_s1  ;;  %110 = vrot.lane.b32.xlu0 %v822_v0, %s747_s1 }
  0x37   :  { %121 = vrot.lane.b32.xlu1 %v832_v3, %s748_s23  ;;  %119 = vrot.lane.b32.xlu0 %v824_v1, %s748_s23 }
  0x3b   :  { %125 = vrot.lane.b32.xlu1 %v830_v2, %s748_s23  ;;  %123 = vrot.lane.b32.xlu0 %v822_v0, %s748_s23 }
  0x3f   :  { %134 = vrot.lane.b32.xlu1 %v832_v3, %s749_s24  ;;  %132 = vrot.lane.b32.xlu0 %v824_v1, %s749_s24 }
  0x43   :  { %138 = vrot.lane.b32.xlu1 %v830_v2, %s749_s24  ;;  %136 = vrot.lane.b32.xlu0 %v822_v0, %s749_s24 }
  0x47   :  { %147 = vrot.lane.b32.xlu1 %v832_v3, %s750_s25  ;;  %145 = vrot.lane.b32.xlu0 %v824_v1, %s750_s25 }
  0x4b   :  { %151 = vrot.lane.b32.xlu1 %v830_v2, %s750_s25  ;;  %149 = vrot.lane.b32.xlu0 %v822_v0, %s750_s25 }
  0x4f   :  { %160 = vrot.lane.b32.xlu1 %v832_v3, %s751_s26  ;;  %158 = vrot.lane.b32.xlu0 %v824_v1, %s751_s26 }
  0x53   :  { %164 = vrot.lane.b32.xlu1 %v830_v2, %s751_s26  ;;  %162 = vrot.lane.b32.xlu0 %v822_v0, %s751_s26 }
  0x57   :  { %173 = vrot.lane.b32.xlu1 %v832_v3, %s752_s27  ;;  %171 = vrot.lane.b32.xlu0 %v824_v1, %s752_s27 }
  0x5b   :  { %177 = vrot.lane.b32.xlu1 %v830_v2, %s752_s27  ;;  %175 = vrot.lane.b32.xlu0 %v822_v0, %s752_s27 }
  0x5f   :  { %186 = vrot.lane.b32.xlu1 %v832_v3, %s754_s28  ;;  %184 = vrot.lane.b32.xlu0 %v824_v1, %s754_s28 }
  0x63   :  { %190 = vrot.lane.b32.xlu1 %v830_v2, %s754_s28  ;;  %188 = vrot.lane.b32.xlu0 %v822_v0, %s754_s28 }
  0x67   :  { %257 = vperm.xlu0 %669, %v254_v5   ;;  %v972_v5 = vld [vmem:[#allocation5 + $0x78] sm:$0xff] }
  0x99   :  { %v96_v7 = vpop.permute.xlu1 %95  ;;  %v92_v8 = vpop.permute.xlu0 %91 }
  0x9d   :  { %v98_v10 = vpop.permute.xlu1 %97  ;;  %v94_v11 = vpop.permute.xlu0 %93 }
  0x9e   :  { %v104_v12 = vsel %vm101_vm0, %v92_v8, %v94_v11  ;;  %v105_v18 = vsel %vm101_vm0, %v98_v10, %v92_v8  ;;  %v103_v21 = vsel %vm101_vm0, %v94_v11, %v96_v7  ;;  %v102_v25 = vsel %vm101_vm0, %v96_v7, %v98_v10 }
  0x9f   :  { %v198_v23 = vmul.f32 %v104_v12, %v906_v13  ;;  %v197_v29 = vmul.f32 %v105_v18, %v910_v17  ;;  %v199_v33 = vmul.f32 %v103_v21, %v916_v20  ;;  %v200_v39 = vmul.f32 %v102_v25, %v928_v27 }
  0xa1   :  { %v109_v15 = vpop.permute.xlu1 %108  ;;  %v107_v16 = vpop.permute.xlu0 %106 }
  0xa2   :  { %v117_v19 = vsel %vm114_vm1, %v107_v16, %v109_v15 }
  0xa3   :  { %v202_v24 = vmul.f32 %v117_v19, %v908_v14 }
  0xa5   :  { %v113_v30 = vpop.permute.xlu1 %112  ;;  %v111_v31 = vpop.permute.xlu0 %110  ;;  %v234_v32 = vpack.c.bf16 %v202_v24, %v198_v23 }
  0xa6   :  { %v118_v34 = vsel %vm114_vm1, %v113_v30, %v107_v16  ;;  %v115_v35 = vsel %vm114_vm1, %v111_v31, %v113_v30  ;;  %v116_v36 = vsel %vm114_vm1, %v109_v15, %v111_v31 }
  0xa7   :  { %v201_v37 = vmul.f32 %v118_v34, %v920_v22  ;;  %v203_v38 = vmul.f32 %v116_v36, %v926_v26  ;;  %277 = vmatprep.subr.bf16.mxu0 %v234_v32  ;;  %v204_v40 = vmul.f32 %v115_v35, %v930_v28  ;;  %v987_v32 = vld [vmem:[#allocation5 + $0x80] sm:$0xff]  ;;  %v991_v34 = vld [vmem:[#allocation5 + $0x98] sm:$0xff]  ;;  %v993_v35 = vld [vmem:[#allocation5 + $0x90] sm:$0xff] }
  0xa8   :  { %v995_v36 = vld [vmem:[#allocation5 + $0xa0] sm:$0xff] }
  0xa9   :  { %v122_v41 = vpop.permute.xlu1 %121  ;;  %v120_v42 = vpop.permute.xlu0 %119  ;;  %v233_v43 = vpack.c.bf16 %v201_v37, %v197_v29  ;;  %v236_v44 = vpack.c.bf16 %v204_v40, %v200_v39  ;;  %v235_v45 = vpack.c.bf16 %v203_v38, %v199_v33  ;;  %v989_v33 = vld [vmem:[#allocation5 + $0x88] sm:$0xff]  ;;  %v999_v38 = vld [vmem:[#allocation5 + $0xb8] sm:$0xff]  ;;  %v1003_v40 = vld [vmem:[#allocation5 + $0xb0] sm:$0xff] }
  0xaa   :  { %v130_v49 = vsel %vm127_vm2, %v120_v42, %v122_v41  ;;  %v1001_v39 = vld [vmem:[#allocation5 + $0xa8] sm:$0xff] }
  0xab   :  { %278 = vmatpush1.bf16.msra.mxu0 %v233_v43  ;;  %318 = vmatprep.subr.bf16.mxu1 %v236_v44  ;;  %v206_v56 = vmul.f32 %v130_v49, %v946_v48  ;;  %v214_v43 = vmul.f32 %v989_v33, %v832_v3  ;;  %v216_v44 = vmul.f32 %v991_v34, %v830_v2 }
  0xac   :  { %319 = vmatpush1.bf16.msra.mxu1 %v235_v45  ;;  %v213_v45 = vmul.f32 %v987_v32, %v824_v1 }
  0xad   :  { %v126_v46 = vpop.permute.xlu1 %125  ;;  %v124_v47 = vpop.permute.xlu0 %123 }
  0xae   :  { %v131_v54 = vsel %vm127_vm2, %v126_v46, %v120_v42  ;;  %v129_v59 = vsel %vm127_vm2, %v122_v41, %v124_v47  ;;  %v128_v61 = vsel %vm127_vm2, %v124_v47, %v126_v46  ;;  %v215_v46 = vmul.f32 %v993_v35, %v822_v0 }
  0xaf   :  { %v205_v6 = vmul.f32 %v131_v54, %v952_v53  ;;  %v207_v11 = vmul.f32 %v129_v59, %v959_v57  ;;  %v208_v18 = vmul.f32 %v128_v61, %v961_v58 }
  0xb1   :  { %v135_v51 = vpop.permute.xlu1 %134  ;;  %v133_v52 = vpop.permute.xlu0 %132 }
  0xb2   :  { %v143_v55 = vsel %vm140_vm3, %v133_v52, %v135_v51 }
  0xb3   :  { %v210_v60 = vmul.f32 %v143_v55, %v950_v50 }
  0xb5   :  { %v139_v7 = vpop.permute.xlu1 %138  ;;  %v137_v8 = vpop.permute.xlu0 %136  ;;  %v238_v10 = vpack.c.bf16 %v210_v60, %v206_v56 }
  0xb6   :  { %v144_v12 = vsel %vm140_vm3, %v139_v7, %v133_v52  ;;  %v141_v15 = vsel %vm140_vm3, %v137_v8, %v139_v7  ;;  %v142_v16 = vsel %vm140_vm3, %v135_v51, %v137_v8 }
  0xb7   :  { %v209_v19 = vmul.f32 %v144_v12, %v968_v62  ;;  %v211_v21 = vmul.f32 %v142_v16, %v970_v63  ;;  %v212_v23 = vmul.f32 %v141_v15, %v972_v5  ;;  %279 = vmatprep.subr.bf16.mxu0 %v238_v10  ;;  %v1025_v16 = vld [vmem:[#allocation5 + $0xd8] sm:$0xff] }
  0xb9   :  { %v148_v24 = vpop.permute.xlu1 %147  ;;  %v146_v25 = vpop.permute.xlu0 %145  ;;  %v237_v29 = vpack.c.bf16 %v209_v19, %v205_v6  ;;  %v240_v30 = vpack.c.bf16 %v212_v23, %v208_v18  ;;  %v239_v31 = vpack.c.bf16 %v211_v21, %v207_v11  ;;  %v1029_v19 = vld [vmem:[#allocation5 + $0xc8] sm:$0xff]  ;;  %v1033_v23 = vld [vmem:[#allocation5 + $0xd0] sm:$0xff] }
  0xba   :  { %v156_v37 = vsel %vm153_vm4, %v146_v25, %v148_v24 }
  0xbb   :  { %280 = vmatpush1.bf16.msra.mxu0 %v237_v29  ;;  %320 = vmatprep.subr.bf16.mxu1 %v240_v30  ;;  %v217_v47 = vmul.f32 %v156_v37, %v995_v36  ;;  %v1041_v30 = vld [vmem:[#allocation5 + $0xf8] sm:$0xff]  ;;  %v1045_v37 = vld [vmem:[#allocation5 + $0xf0] sm:$0xff] }
  0xbc   :  { %321 = vmatpush1.bf16.msra.mxu1 %v239_v31  ;;  %v1043_v31 = vld [vmem:[#allocation5 + $0xe8] sm:$0xff] }
  0xbd   :  { %v152_v41 = vpop.permute.xlu1 %151  ;;  %v150_v42 = vpop.permute.xlu0 %149  ;;  %v241_v8 = vpack.c.bf16 %v217_v47, %v213_v45 }
  0xbe   :  { %v157_v49 = vsel %vm153_vm4, %v152_v41, %v146_v25  ;;  %v154_v51 = vsel %vm153_vm4, %v150_v42, %v152_v41  ;;  %v155_v52 = vsel %vm153_vm4, %v148_v24, %v150_v42  ;;  %v1035_v24 = vld [vmem:[#allocation5 + $0xe0] sm:$0xff] }
  0xbf   :  { %v220_v54 = vmul.f32 %v157_v49, %v999_v38  ;;  %v218_v55 = vmul.f32 %v155_v52, %v1001_v39  ;;  %v219_v56 = vmul.f32 %v154_v51, %v1003_v40  ;;  %v1047_v41 = vld [vmem:[#allocation5 + $0xc0] sm:$0xff] }
  0xc1   :  { %v161_v59 = vpop.permute.xlu1 %160  ;;  %v159_v60 = vpop.permute.xlu0 %158  ;;  %v242_v61 = vpack.c.bf16 %v218_v55, %v214_v43  ;;  %v244_v6 = vpack.c.bf16 %v220_v54, %v216_v44  ;;  %v243_v7 = vpack.c.bf16 %v219_v56, %v215_v46 }
  0xc2   :  { %v169_v42 = vsel %vm166_vm6, %v159_v60, %v161_v59 }
  0xc3   :  { %281 = vmatprep.subr.bf16.mxu0 %v242_v61  ;;  %322 = vmatprep.subr.bf16.mxu1 %v244_v6  ;;  %v1066_v61 = vld [vmem:[#allocation5 + $0x100] sm:$0xff] }
  0xc4   :  { %282 = vmatpush1.bf16.msra.mxu0 %v241_v8  ;;  %323 = vmatpush1.bf16.msra.mxu1 %v243_v7 }
  0xc5   :  { %v165_v10 = vpop.permute.xlu1 %164  ;;  %v163_v11 = vpop.permute.xlu0 %162 }
  0xc6   :  { %v170_v18 = vsel %vm166_vm6, %v165_v10, %v159_v60  ;;  %v168_v21 = vsel %vm166_vm6, %v161_v59, %v163_v11  ;;  %v167_v29 = vsel %vm166_vm6, %v163_v11, %v165_v10  ;;  %v221_v60 = vmul.f32 %v169_v42, %v1047_v41 }
  0xc7   :  { %v224_v43 = vmul.f32 %v170_v18, %v1025_v16  ;;  %v222_v44 = vmul.f32 %v168_v21, %v1029_v19  ;;  %v223_v54 = vmul.f32 %v167_v29, %v1033_v23  ;;  %v1071_v21 = vld [vmem:[#allocation5 + $0x118] sm:$0xff]  ;;  %v1075_v29 = vld [vmem:[#allocation5 + $0x110] sm:$0xff] }
  0xc9   :  { %v174_v12 = vpop.permute.xlu1 %173  ;;  %v172_v15 = vpop.permute.xlu0 %171 }
  0xca   :  { %v182_v25 = vsel %vm179_vm5, %v172_v15, %v174_v12 }
  0xcb   :  { %v225_v47 = vmul.f32 %v182_v25, %v1035_v24  ;;  %v1073_v25 = vld [vmem:[#allocation5 + $0x108] sm:$0xff] }
  0xcd   :  { %v178_v45 = vpop.permute.xlu1 %177  ;;  %v176_v46 = vpop.permute.xlu0 %175 }
  0xce   :  { %v183_v49 = vsel %vm179_vm5, %v178_v45, %v172_v15  ;;  %v180_v51 = vsel %vm179_vm5, %v176_v46, %v178_v45  ;;  %v181_v52 = vsel %vm179_vm5, %v174_v12, %v176_v46  ;;  %v245_v15 = vpack.c.bf16 %v225_v47, %v221_v60 }
  0xcf   :  { %v228_v55 = vmul.f32 %v183_v49, %v1041_v30  ;;  %v226_v56 = vmul.f32 %v181_v52, %v1043_v31  ;;  %v227_v59 = vmul.f32 %v180_v51, %v1045_v37 }
  0xd1   :  { %v187_v6 = vpop.permute.xlu1 %186  ;;  %v185_v7 = vpop.permute.xlu0 %184  ;;  %v246_v8 = vpack.c.bf16 %v226_v56, %v222_v44  ;;  %v248_v10 = vpack.c.bf16 %v228_v55, %v224_v43  ;;  %v247_v11 = vpack.c.bf16 %v227_v59, %v223_v54 }
  0xd2   :  { %v195_v12 = vsel %vm192_vm7, %v185_v7, %v187_v6 }
  0xd3   :  { %v229_v18 = vmul.f32 %v195_v12, %v1066_v61  ;;  %283 = vmatprep.subr.bf16.mxu0 %v246_v8  ;;  %324 = vmatprep.subr.bf16.mxu1 %v248_v10 }
  0xd4   :  { %284 = vmatpush1.bf16.msra.mxu0 %v245_v15  ;;  %325 = vmatpush1.bf16.msra.mxu1 %v247_v11 }
  0xd5   :  { %v191_v42 = vpop.permute.xlu1 %190  ;;  %v189_v44 = vpop.permute.xlu0 %188  ;;  %v249_v47 = vpack.c.bf16 %v229_v18, %v229_v18 }
  0xd6   :  { %v196_v43 = vsel %vm192_vm7, %v191_v42, %v185_v7  ;;  %v193_v45 = vsel %vm192_vm7, %v189_v44, %v191_v42  ;;  %v194_v46 = vsel %vm192_vm7, %v187_v6, %v189_v44  ;;  %v253_v6 = vld [vmem:[%s1303_s2] sm:$0xf] }
  0xd7   :  { %v232_v49 = vmul.f32 %v196_v43, %v1071_v21  ;;  %v230_v51 = vmul.f32 %v194_v46, %v1073_v25  ;;  %v231_v52 = vmul.f32 %v193_v45, %v1075_v29  ;;  %v266_v59 = vsel %vm264_vm8, %v249_v47, 0 }
  0xd9   :  { %v252_v54 = vpack.c.bf16 %v232_v49, %v232_v49  ;;  %v250_v55 = vpack.c.bf16 %v230_v51, %v230_v51  ;;  %v251_v56 = vpack.c.bf16 %v231_v52, %v231_v52 }
  0xdb   :  { %647 = vmatprep.subr.msk.bf16.mxu0 %vm264_vm8, %v250_v55  ;;  %649 = vmatprep.subr.msk.bf16.mxu1 %vm264_vm8, %v252_v54  ;;  %v272_v60 = vsel %vm264_vm8, %v251_v56, 0  ;;  %v516_v54 = vld [vmem:[%s1306_s5] sm:$0xff] }
  0xdc   :  { %286 = vmatpush1.bf16.msra.mxu0 %v266_v59  ;;  %327 = vmatpush1.bf16.msra.mxu1 %v272_v60 }
  0xdf   :  { %648 = vmatmul.mubr.msk.bf16.vlgmr.msra.gmra.mrb[0].mxu0 %vm260_vm9, %v253_v6  ;;  %650 = vmatmul.mubr.msk.bf16.vlgmr.msra.gmra.mrb[0].mxu1 %vm260_vm9, %v253_v6 }
  0xe0   :  { %569 = vmatprep.mubr.bf16.mxu0 %v753_v4  ;;  %610 = vmatprep.mubr.bf16.mxu1 %v753_v4 }
  0xe6   :  { %v258_v7 = vpop.permute.xlu0 %257 }
 0x1b2   :  { %v352_v8 = vpop.f32.mrb[0].mxu1  ;;  %v311_v10 = vpop.f32.mrb[0].mxu0 }
 0x1b3   :  { %v353_v11 = vadd.f32 %v352_v8, %v258_v7  ;;  %v312_v12 = vadd.f32 %v311_v10, %v258_v7  ;;  %v313_v15 = vpop.f32.mrb[1].mxu0  ;;  %v354_v18 = vpop.f32.mrb[1].mxu1 }
 0x1b4   :  { %v315_v42 = vpop.f32.mrb[2].mxu0  ;;  %v356_v44 = vpop.f32.mrb[2].mxu1  ;;  %v314_v46 = vadd.f32 %v313_v15, %v258_v7  ;;  %v355_v51 = vadd.f32 %v354_v18, %v258_v7 }
 0x1b5   :  { %v1097_v43 = vmax.f32 %v353_v11, 0.0  ;;  %v1099_v45 = vmax.f32 %v312_v12, 0.0  ;;  %v316_v47 = vpop.f32.mrb[3].mxu0  ;;  %v357_v49 = vpop.f32.mrb[3].mxu1 }
 0x1b6   :  { %v1105_v4 = vmax.f32 %v314_v46, 0.0  ;;  %v1111_v52 = vmax.f32 %v355_v51, 0.0 }
 0x1b7   :  { %367 = vrot.lane.b32.xlu0 %v1097_v43, %s746_s22  ;;  %363 = vrot.lane.b32.xlu1 %v1099_v45, %s746_s22 }
 0x1bb   :  { %375 = vrot.lane.b32.xlu0 %v1099_v45, %s747_s1  ;;  %365 = vrot.lane.b32.xlu1 %v1105_v4, %s746_s22 }
 0x1bf   :  { %379 = vrot.lane.b32.xlu0 %v1097_v43, %s747_s1  ;;  %369 = vrot.lane.b32.xlu1 %v1111_v52, %s746_s22 }
 0x1c3   :  { %387 = vrot.lane.b32.xlu0 %v1099_v45, %s748_s23  ;;  %377 = vrot.lane.b32.xlu1 %v1105_v4, %s747_s1 }
 0x1c7   :  { %391 = vrot.lane.b32.xlu0 %v1097_v43, %s748_s23  ;;  %381 = vrot.lane.b32.xlu1 %v1111_v52, %s747_s1 }
 0x1cb   :  { %399 = vrot.lane.b32.xlu0 %v1099_v45, %s749_s24  ;;  %389 = vrot.lane.b32.xlu1 %v1105_v4, %s748_s23 }
 0x1cf   :  { %403 = vrot.lane.b32.xlu0 %v1097_v43, %s749_s24  ;;  %393 = vrot.lane.b32.xlu1 %v1111_v52, %s748_s23 }
 0x1d3   :  { %411 = vrot.lane.b32.xlu0 %v1099_v45, %s750_s25  ;;  %401 = vrot.lane.b32.xlu1 %v1105_v4, %s749_s24 }
 0x1d7   :  { %415 = vrot.lane.b32.xlu0 %v1097_v43, %s750_s25  ;;  %405 = vrot.lane.b32.xlu1 %v1111_v52, %s749_s24 }
 0x1db   :  { %423 = vrot.lane.b32.xlu0 %v1099_v45, %s751_s26  ;;  %413 = vrot.lane.b32.xlu1 %v1105_v4, %s750_s25 }
 0x1df   :  { %427 = vrot.lane.b32.xlu0 %v1097_v43, %s751_s26  ;;  %417 = vrot.lane.b32.xlu1 %v1111_v52, %s750_s25 }
 0x1e3   :  { %435 = vrot.lane.b32.xlu0 %v1099_v45, %s752_s27  ;;  %425 = vrot.lane.b32.xlu1 %v1105_v4, %s751_s26 }
 0x1e7   :  { %439 = vrot.lane.b32.xlu0 %v1097_v43, %s752_s27  ;;  %429 = vrot.lane.b32.xlu1 %v1111_v52, %s751_s26 }
 0x1eb   :  { %447 = vrot.lane.b32.xlu0 %v1099_v45, %s754_s28  ;;  %437 = vrot.lane.b32.xlu1 %v1105_v4, %s752_s27 }
 0x1ef   :  { %451 = vrot.lane.b32.xlu0 %v1097_v43, %s754_s28  ;;  %441 = vrot.lane.b32.xlu1 %v1111_v52, %s752_s27 }
 0x1f3   :  { %519 = vperm.xlu0 %669, %v516_v54   ;;  %449 = vrot.lane.b32.xlu1 %v1105_v4, %s754_s28 }
 0x1f7   :  { %453 = vrot.lane.b32.xlu1 %v1111_v52, %s754_s28 }
 0x229   :  { %v368_v55 = vpop.permute.xlu0 %367  ;;  %v364_v56 = vpop.permute.xlu1 %363 }
 0x22d   :  { %v376_v59 = vpop.permute.xlu0 %375  ;;  %v366_v60 = vpop.permute.xlu1 %365 }
 0x22e   :  { %v373_v8 = vsel %vm101_vm0, %v364_v56, %v366_v60  ;;  %v372_v47 = vsel %vm101_vm0, %v366_v60, %v368_v55 }
 0x22f   :  { %v460_v15 = vmul.f32 %v373_v8, %v906_v13 }
 0x231   :  { %v380_v6 = vpop.permute.xlu0 %379  ;;  %v370_v7 = vpop.permute.xlu1 %369 }
 0x232   :  { %v371_v44 = vsel %vm101_vm0, %v368_v55, %v370_v7  ;;  %v374_v46 = vsel %vm101_vm0, %v370_v7, %v364_v56  ;;  %v461_v55 = vmul.f32 %v372_v47, %v916_v20 }
 0x233   :  { %v459_v8 = vmul.f32 %v374_v46, %v910_v17 }
 0x235   :  { %v388_v10 = vpop.permute.xlu0 %387  ;;  %v378_v11 = vpop.permute.xlu1 %377 }
 0x236   :  { %v385_v12 = vsel %vm114_vm1, %v376_v59, %v378_v11  ;;  %v384_v18 = vsel %vm114_vm1, %v378_v11, %v380_v6  ;;  %v462_v11 = vmul.f32 %v371_v44, %v928_v27 }
 0x237   :  { %v464_v42 = vmul.f32 %v385_v12, %v908_v14  ;;  %v465_v2 = vmul.f32 %v384_v18, %v926_v26 }
 0x239   :  { %v392_v49 = vpop.permute.xlu0 %391  ;;  %v382_v51 = vpop.permute.xlu1 %381  ;;  %v496_v54 = vpack.c.bf16 %v464_v42, %v460_v15  ;;  %v497_v18 = vpack.c.bf16 %v465_v2, %v461_v55 }
 0x23a   :  { %v383_v13 = vsel %vm114_vm1, %v380_v6, %v382_v51  ;;  %v386_v14 = vsel %vm114_vm1, %v382_v51, %v376_v59 }
 0x23b   :  { %v463_v56 = vmul.f32 %v386_v14, %v920_v22  ;;  %v466_v7 = vmul.f32 %v383_v13, %v930_v28  ;;  %537 = vmatprep.subr.bf16.mxu0 %v496_v54 }
 0x23d   :  { %v495_v60 = vpack.c.bf16 %v463_v56, %v459_v8  ;;  %v400_v12 = vpop.permute.xlu0 %399  ;;  %v390_v26 = vpop.permute.xlu1 %389  ;;  %v498_v15 = vpack.c.bf16 %v466_v7, %v462_v11 }
 0x23e   :  { %v397_v17 = vsel %vm127_vm2, %v388_v10, %v390_v26  ;;  %v396_v47 = vsel %vm127_vm2, %v390_v26, %v392_v49 }
 0x23f   :  { %538 = vmatpush1.bf16.msra.mxu0 %v495_v60  ;;  %578 = vmatprep.subr.bf16.mxu1 %v498_v15  ;;  %v468_v20 = vmul.f32 %v397_v17, %v946_v48 }
 0x240   :  { %579 = vmatpush1.bf16.msra.mxu1 %v497_v18 }
 0x241   :  { %v404_v59 = vpop.permute.xlu0 %403  ;;  %v394_v6 = vpop.permute.xlu1 %393 }
 0x242   :  { %v395_v44 = vsel %vm127_vm2, %v392_v49, %v394_v6  ;;  %v398_v46 = vsel %vm127_vm2, %v394_v6, %v388_v10  ;;  %v469_v49 = vmul.f32 %v396_v47, %v959_v57  ;;  %v476_v57 = vmul.f32 %v1105_v4, %v989_v33 }
 0x243   :  { %v467_v8 = vmul.f32 %v398_v46, %v952_v53  ;;  %v470_v11 = vmul.f32 %v395_v44, %v961_v58  ;;  %v475_v58 = vmul.f32 %v1099_v45, %v987_v32  ;;  %v478_v33 = vmul.f32 %v1111_v52, %v991_v34 }
 0x245   :  { %v412_v27 = vpop.permute.xlu0 %411  ;;  %v402_v22 = vpop.permute.xlu1 %401 }
 0x246   :  { %v409_v28 = vsel %vm140_vm3, %v400_v12, %v402_v22  ;;  %v408_v42 = vsel %vm140_vm3, %v402_v22, %v404_v59 }
 0x247   :  { %v472_v2 = vmul.f32 %v409_v28, %v950_v50  ;;  %v473_v14 = vmul.f32 %v408_v42, %v970_v63 }
 0x249   :  { %v416_v51 = vpop.permute.xlu0 %415  ;;  %v406_v54 = vpop.permute.xlu1 %405  ;;  %v500_v13 = vpack.c.bf16 %v472_v2, %v468_v20  ;;  %v501_v26 = vpack.c.bf16 %v473_v14, %v469_v49 }
 0x24a   :  { %v407_v48 = vsel %vm140_vm3, %v404_v59, %v406_v54  ;;  %v410_v50 = vsel %vm140_vm3, %v406_v54, %v400_v12 }
 0x24b   :  { %v471_v10 = vmul.f32 %v410_v50, %v968_v62  ;;  %v474_v56 = vmul.f32 %v407_v48, %v972_v5  ;;  %539 = vmatprep.subr.bf16.mxu0 %v500_v13 }
 0x24d   :  { %v499_v7 = vpack.c.bf16 %v471_v10, %v467_v8  ;;  %v424_v55 = vpop.permute.xlu0 %423  ;;  %v414_v63 = vpop.permute.xlu1 %413  ;;  %v502_v60 = vpack.c.bf16 %v474_v56, %v470_v11 }
 0x24e   :  { %v420_v15 = vsel %vm153_vm4, %v414_v63, %v416_v51  ;;  %v421_v53 = vsel %vm153_vm4, %v412_v27, %v414_v63 }
 0x24f   :  { %v479_v62 = vmul.f32 %v421_v53, %v995_v36  ;;  %v480_v5 = vmul.f32 %v420_v15, %v1001_v39  ;;  %540 = vmatpush1.bf16.msra.mxu0 %v499_v7  ;;  %580 = vmatprep.subr.bf16.mxu1 %v502_v60  ;;  %v477_v36 = vmul.f32 %v1097_v43, %v993_v35 }
 0x250   :  { %581 = vmatpush1.bf16.msra.mxu1 %v501_v26 }
 0x251   :  { %v503_v12 = vpack.c.bf16 %v479_v62, %v475_v58  ;;  %v428_v18 = vpop.permute.xlu0 %427  ;;  %v418_v59 = vpop.permute.xlu1 %417  ;;  %v504_v6 = vpack.c.bf16 %v480_v5, %v476_v57 }
 0x252   :  { %v419_v17 = vsel %vm153_vm4, %v416_v51, %v418_v59  ;;  %v422_v32 = vsel %vm153_vm4, %v418_v59, %v412_v27 }
 0x253   :  { %v481_v39 = vmul.f32 %v419_v17, %v1003_v40  ;;  %v482_v45 = vmul.f32 %v422_v32, %v999_v38  ;;  %541 = vmatprep.subr.bf16.mxu0 %v504_v6 }
 0x254   :  { %542 = vmatpush1.bf16.msra.mxu0 %v503_v12 }
 0x255   :  { %v505_v4 = vpack.c.bf16 %v481_v39, %v477_v36  ;;  %v436_v22 = vpop.permute.xlu0 %435  ;;  %v426_v28 = vpop.permute.xlu1 %425  ;;  %v506_v20 = vpack.c.bf16 %v482_v45, %v478_v33 }
 0x256   :  { %v432_v35 = vsel %vm166_vm6, %v426_v28, %v428_v18  ;;  %v433_v40 = vsel %vm166_vm6, %v424_v55, %v426_v28 }
 0x257   :  { %582 = vmatprep.subr.bf16.mxu1 %v506_v20  ;;  %v483_v52 = vmul.f32 %v433_v40, %v1047_v41  ;;  %v484_v2 = vmul.f32 %v432_v35, %v1029_v19 }
 0x258   :  { %583 = vmatpush1.bf16.msra.mxu1 %v505_v4 }
 0x259   :  { %v440_v42 = vpop.permute.xlu0 %439  ;;  %v430_v27 = vpop.permute.xlu1 %429 }
 0x25a   :  { %v431_v51 = vsel %vm166_vm6, %v428_v18, %v430_v27  ;;  %v434_v54 = vsel %vm166_vm6, %v430_v27, %v424_v55 }
 0x25b   :  { %v485_v41 = vmul.f32 %v431_v51, %v1033_v23 }
 0x25d   :  { %v438_v38 = vpop.permute.xlu1 %437  ;;  %v448_v44 = vpop.permute.xlu0 %447 }
 0x25e   :  { %v444_v43 = vsel %vm179_vm5, %v438_v38, %v440_v42  ;;  %v445_v34 = vsel %vm179_vm5, %v436_v22, %v438_v38 }
 0x25f   :  { %v487_v46 = vmul.f32 %v445_v34, %v1035_v24  ;;  %v488_v47 = vmul.f32 %v444_v43, %v1043_v31  ;;  %v486_v24 = vmul.f32 %v434_v54, %v1025_v16 }
 0x261   :  { %v507_v13 = vpack.c.bf16 %v487_v46, %v483_v52  ;;  %v442_v14 = vpop.permute.xlu1 %441  ;;  %v508_v48 = vpack.c.bf16 %v488_v47, %v484_v2  ;;  %v452_v11 = vpop.permute.xlu0 %451 }
 0x262   :  { %v443_v50 = vsel %vm179_vm5, %v440_v42, %v442_v14  ;;  %v446_v19 = vsel %vm179_vm5, %v442_v14, %v436_v22  ;;  %v1310_v42 = vld [vmem:[#allocation11_spill] sm:$0xff] }
 0x263   :  { %v489_v31 = vmul.f32 %v443_v50, %v1045_v37  ;;  %v490_v8 = vmul.f32 %v446_v19, %v1041_v30  ;;  %543 = vmatprep.subr.bf16.mxu0 %v508_v48 }
 0x264   :  { %544 = vmatpush1.bf16.msra.mxu0 %v507_v13 }
 0x265   :  { %v509_v10 = vpack.c.bf16 %v489_v31, %v485_v41  ;;  %v450_v56 = vpop.permute.xlu1 %449  ;;  %v510_v49 = vpack.c.bf16 %v490_v8, %v486_v24 }
 0x266   :  { %v456_v7 = vsel %vm192_vm7, %v450_v56, %v452_v11  ;;  %v457_v55 = vsel %vm192_vm7, %v448_v44, %v450_v56 }
 0x267   :  { %v491_v23 = vmul.f32 %v457_v55, %v1066_v61  ;;  %v492_v16 = vmul.f32 %v456_v7, %v1073_v25  ;;  %584 = vmatprep.subr.bf16.mxu1 %v510_v49  ;;  %v515_v25 = vld [vmem:[%s1305_s4] sm:$0xf]  ;;  %s755_s4 = smov [#allocation7]  }
 0x268   :  { %585 = vmatpush1.bf16.msra.mxu1 %v509_v10  ;;  %s637_s10 = sshll.u32 %s755_s4, 4  ;;  %s638_s10 = int_to_ptr.vmem [resolvable:$true] %s637_s10 }
 0x269   :  { %v511_v37 = vpack.c.bf16 %v491_v23, %v491_v23  ;;  %v512_v30 = vpack.c.bf16 %v492_v16, %v492_v16  ;;  %v454_v63 = vpop.permute.xlu1 %453  ;;  %s714_s11 = scalar_lea.vmem %s638_s10, 512  ;;  %p719_p3 = scmp.lt.s32.totalorder %s638_s10, %s638_s10 }
 0x26a   :  { %v455_v60 = vsel %vm192_vm7, %v452_v11, %v454_v63  ;;  %v458_v26 = vsel %vm192_vm7, %v454_v63, %v448_v44  ;;  %p715_p2 = scmp.ne.s32.totalorder %s638_s10, %s714_s11  ;;  %p720_p4 = scmp.lt.s32.totalorder %s714_s11, %s714_s11 }
 0x26b   :  { %v493_v15 = vmul.f32 %v455_v60, %v1075_v29  ;;  %v494_v53 = vmul.f32 %v458_v26, %v1071_v21  ;;  %651 = vmatprep.subr.msk.bf16.mxu0 %vm264_vm8, %v512_v30  ;;  %v526_v61 = vsel %vm264_vm8, %v511_v37, 0 }
 0x26c   :  { %546 = vmatpush1.bf16.msra.mxu0 %v526_v61  ;;  %p721_p5 = por %p720_p4, %p719_p3 }
 0x26d   :  { %v513_v58 = vpack.c.bf16 %v493_v15, %v493_v15  ;;  %v514_v62 = vpack.c.bf16 %v494_v53, %v494_v53 }
 0x26e   :  { %p722_p6 = pnand %p721_p5, %p715_p2 }
 0x26f   :  { %652 = vmatmul.mubr.msk.bf16.vlgmr.msra.gmra.mrb[4].mxu0 %vm260_vm9, %v515_v25  ;;  %653 = vmatprep.subr.msk.bf16.mxu1 %vm264_vm8, %v514_v62  ;;  %v532_v9 = vsel %vm264_vm8, %v513_v58, 0 }
 0x270   :  { %587 = vmatpush1.bf16.msra.mxu1 %v532_v9 }
 0x272   :  { %v520_v21 = vpop.permute.xlu0 %519 }
 0x273   :  { %654 = vmatmul.mubr.msk.bf16.vlgmr.msra.gmra.mrb[4].mxu1 %vm260_vm9, %v515_v25 }
 0x342   :  { %v571_v29 = vpop.f32.mrb[4].mxu0 }
 0x343   :  { %v572_v5 = vadd.f32 %v571_v29, %v520_v21  ;;  %v573_v57 = vpop.f32.mrb[5].mxu0 }
 0x344   :  { %v574_v12 = vadd.f32 %v573_v57, %v520_v21  ;;  %v575_v18 = vpop.f32.mrb[6].mxu0 }
 0x345   :  { %v619_v59 = vadd.f32 %v572_v5, %v824_v1  ;;  %v576_v6 = vpop.f32.mrb[7].mxu0 }
 0x346   :  { %v620_v17 = vadd.f32 %v574_v12, %v832_v3  ;;  %v612_v32 = vpop.f32.mrb[4].mxu1 }
 0x347   :  { %v623_v36 = vmax.f32 %v619_v59, 0.0  ;;  %v613_v39 = vadd.f32 %v612_v32, %v520_v21  ;;  %v614_v45 = vpop.f32.mrb[5].mxu1 }
 0x348   :  { %v624_v33 = vmax.f32 %v620_v17, 0.0  ;;  %v615_v4 = vadd.f32 %v614_v45, %v520_v21  ;;  %v616_v22 = vpop.f32.mrb[6].mxu1 }
 0x349   :  { %627 = vst [vmem:[#allocation7] sm:$0xff] %v623_v36  ;;  %v621_v28 = vadd.f32 %v613_v39, %v822_v0  ;;  %v617_v20 = vpop.f32.mrb[7].mxu1 }
 0x34a   :  { %628 = vst [vmem:[#allocation7 + $0x8] sm:$0xff] %v624_v33  ;;  %v622_v27 = vadd.f32 %v615_v4, %v1310_v42 }
 0x34b   :  { %v625_v1 = vmax.f32 %v621_v28, 0.0 }
 0x34c   :  { %v626_v35 = vmax.f32 %v622_v27, 0.0 }
 0x34d   :  { %629 = vst [vmem:[#allocation7 + $0x10] sm:$0xff] %v625_v1 }
 0x34e   :  { %630 = vst [vmem:[#allocation7 + $0x18] sm:$0xff] %v626_v35 }
 0x34f   :  { %725 = shalt.err (!%p722_p6)
}
 0x350   :  { %s726_s14 = scalar_lea.hbm %s1307_s6, 512 }
 0x351   :  { %p727_p7 = scmp.ne.s32.totalorder %s1307_s6, %s726_s14  ;;  %p730_p8 = scmp.lt.u32.totalorder %s726_s14, %s1307_s6 }
 0x353   :  { %p732_p9 = pnand %p730_p8, %p727_p7 }
 0x355   :  { %735 = shalt.err (!%p732_p9)
}
 0x356   :  { %640 = dma.vmem_to_hbm [thread:$0]  %s638_s10, 512, %s1307_s6, [#allocation4]  }
 0x357   :  { %740 = dma.done.wait [#allocation4], 512  }
 0x358   :  { %741 = vsyncadd [#allocation4], 4294966784 }
 0x359   :  { %644 = vsyncpa [#allocation3], 1 }
 0x35a   :  { %645 = vsyncpa [#allocation6], 1 }
 0x35b   :  { %646 = vsyncpa [#allocation4], 1 }

</bundles_post_ra>
